<compile_context>
chip_gen: v6e
topology: v6e:2x2x1
jax: 0.10.0
libtpu: 0.0.40
codegen_flags: <defaults>
</compile_context>

<pallas_src>
import jax
import jax.numpy as jnp
from jax.experimental import pallas as pl
from jax.experimental.pallas import tpu as pltpu


def _combine_nets_kernel(x_ref, wb_ref, bb_ref, wh_ref, bh_ref, out_ref):
    # x_ref : (B, S, D)     wb_ref : (D, H)      bb_ref : (1, H)
    # wh_ref: (H, Cpad)     bh_ref : (1, Cpad)   out_ref: (B, Cpad)
    x = x_ref[...].astype(jnp.float32)
    inv_s = jnp.float32(1.0) / jnp.float32(x.shape[1])

    # --- mean over seq FIRST (commutes with the affine basemodel) ---------
    pooled_x = jnp.sum(x, axis=1) * inv_s                       # (B, D)

    # --- basemodel (affine) applied to the pooled representation ----------
    pooled = (
        jnp.dot(pooled_x, wb_ref[...], preferred_element_type=jnp.float32)
        + bb_ref[...]
    )                                                            # (B, H)

    # --- headmodel: Linear(H, Cpad) ---------------------------------------
    logits = (
        jnp.dot(pooled, wh_ref[...], preferred_element_type=jnp.float32)
        + bh_ref[...]
    )                                                            # (B, Cpad)

    out_ref[...] = logits.astype(out_ref.dtype)


def combine_nets_forward(x, w_base, b_base, w_head, b_head):
    B, S, D = x.shape
    H, C = w_head.shape

    # Lane-dense output: pad class dim to a multiple of 128 so the final
    # store is an unmasked full-lane vst; slice back to C afterwards.
    C_pad = ((C + 127) // 128) * 128
    w_head_p = jnp.pad(w_head.astype(jnp.float32), ((0, 0), (0, C_pad - C)))
    b_head_p = jnp.pad(b_head.astype(jnp.float32), ((0, 0), (0, C_pad - C)))

    vmem = pl.BlockSpec(memory_space=pltpu.MemorySpace.VMEM)
    out_pad = pl.pallas_call(
        _combine_nets_kernel,
        out_shape=jax.ShapeDtypeStruct((B, C_pad), jnp.float32),
        in_specs=[vmem, vmem, vmem, vmem, vmem],
        out_specs=vmem,
    )(x, w_base, b_base, w_head_p, b_head_p)
    return out_pad[:, :C]


def _reference(x, w_base, b_base, w_head, b_head):
    # Original module order: base -> last_hidden_state -> mean(dim=1) -> head.
    hidden = jnp.einsum("bsd,dh->bsh", x, w_base) + b_base
    pooled = hidden.mean(axis=1)
    return pooled @ w_head + b_head


if __name__ == "__main__":
    B, S, D, H, C = 2, 8, 32, 32, 4  # batch, seq, embed, hidden, num_classes

    key = jax.random.PRNGKey(0)
    kx, kwb, kbb, kwh, kbh = jax.random.split(key, 5)

    x = jax.random.normal(kx, (B, S, D), dtype=jnp.float32)
    w_base = jax.random.normal(kwb, (D, H), dtype=jnp.float32) * 0.02
    b_base = jax.random.normal(kbb, (1, H), dtype=jnp.float32) * 0.02
    w_head = jax.random.normal(kwh, (H, C), dtype=jnp.float32) * 0.02
    b_head = jax.random.normal(kbh, (1, C), dtype=jnp.float32) * 0.02

    out = combine_nets_forward(x, w_base, b_base, w_head, b_head)
    out = jax.block_until_ready(out)

    ref = _reference(x, w_base, b_base, w_head, b_head)
    assert out.shape == (B, C)
    assert jnp.allclose(out, ref, atol=1e-5, rtol=1e-5)

    print("KERNEL_OK")
</pallas_src>

<mosaic_0001>
module attributes {stable_mosaic.version = 11 : i64} {
  func.func @_combine_nets_kernel(%arg0: memref<2x8x32xf32, #tpu.memory_space<vmem>>, %arg1: memref<32x32xf32, #tpu.memory_space<vmem>>, %arg2: memref<1x32xf32, #tpu.memory_space<vmem>>, %arg3: memref<32x128xf32, #tpu.memory_space<vmem>>, %arg4: memref<1x128xf32, #tpu.memory_space<vmem>>, %arg5: memref<2x128xf32, #tpu.memory_space<vmem>>) attributes {dimension_semantics = [], scalar_prefetch = 0 : i64, scratch_operands = 0 : i64, tpu.core_type = #tpu.core_type<tc>} {
    %c0 = arith.constant 0 : index
    %c0_0 = arith.constant 0 : index
    %c0_1 = arith.constant 0 : index
    %0 = vector.load %arg0[%c0, %c0_0, %c0_1] : memref<2x8x32xf32, #tpu.memory_space<vmem>>, vector<2x8x32xf32>
    %cst = arith.constant 1.000000e+00 : f32
    %cst_2 = arith.constant 8.000000e+00 : f32
    %1 = arith.divf %cst, %cst_2 : f32
    %cst_3 = arith.constant dense<0.000000e+00> : vector<2x32xf32>
    %2 = vector.multi_reduction <add>, %0, %cst_3 [1] : vector<2x8x32xf32> to vector<2x32xf32>
    %3 = vector.broadcast %1 : f32 to vector<2x32xf32>
    %4 = arith.mulf %2, %3 : vector<2x32xf32>
    %c0_4 = arith.constant 0 : index
    %c0_5 = arith.constant 0 : index
    %5 = vector.load %arg1[%c0_4, %c0_5] : memref<32x32xf32, #tpu.memory_space<vmem>>, vector<32x32xf32>
    %cst_6 = arith.constant dense<0.000000e+00> : vector<2x32xf32>
    %6 = tpu.matmul %4, %5, %cst_6 {dimension_numbers = #tpu.dot_dimension_numbers<[1], [0], [0], [1], [0, 0, 1, 1], [], []>} : vector<2x32xf32>, vector<32x32xf32>, vector<2x32xf32> -> vector<2x32xf32>
    %c0_7 = arith.constant 0 : index
    %c0_8 = arith.constant 0 : index
    %7 = vector.load %arg2[%c0_7, %c0_8] : memref<1x32xf32, #tpu.memory_space<vmem>>, vector<1x32xf32>
    %8 = vector.broadcast %7 : vector<1x32xf32> to vector<2x32xf32>
    %9 = arith.addf %6, %8 : vector<2x32xf32>
    %c0_9 = arith.constant 0 : index
    %c0_10 = arith.constant 0 : index
    %10 = vector.load %arg3[%c0_9, %c0_10] : memref<32x128xf32, #tpu.memory_space<vmem>>, vector<32x128xf32>
    %cst_11 = arith.constant dense<0.000000e+00> : vector<2x128xf32>
    %11 = tpu.matmul %9, %10, %cst_11 {dimension_numbers = #tpu.dot_dimension_numbers<[1], [0], [0], [1], [0, 0, 1, 1], [], []>} : vector<2x32xf32>, vector<32x128xf32>, vector<2x128xf32> -> vector<2x128xf32>
    %c0_12 = arith.constant 0 : index
    %c0_13 = arith.constant 0 : index
    %12 = vector.load %arg4[%c0_12, %c0_13] : memref<1x128xf32, #tpu.memory_space<vmem>>, vector<1x128xf32>
    %13 = vector.broadcast %12 : vector<1x128xf32> to vector<2x128xf32>
    %14 = arith.addf %11, %13 : vector<2x128xf32>
    %c0_14 = arith.constant 0 : index
    %c0_15 = arith.constant 0 : index
    %15 = vector.load %arg5[%c0_14, %c0_15] : memref<2x128xf32, #tpu.memory_space<vmem>>, vector<2x128xf32>
    tpu.vector_store %arg5[%c0_14, %c0_15], %14 {strides = array<i32>} : memref<2x128xf32, #tpu.memory_space<vmem>>, vector<2x128xf32>,
    return
  }
}

</mosaic_0001>

<bundles_post_ra>
// kernel: tpu_custom_call.1
= control target key start
LH: loop header
LB: loop body
LE: loop exit
PB: predicated region body
PF: predicated region fallthrough
CT: control target
= control target key end

     0   :  { %10 = vsyncpa [#allocation3], 0  ;;  %s459_s0 = inlined_call_operand.hbm [shape: f32[2,8,32], index: 0, kind: input, shape index: {}]   ;;  %s460_s1 = inlined_call_operand.hbm [shape: f32[32,32], index: 1, kind: input, shape index: {}]   ;;  %s461_s2 = inlined_call_operand.vmem [shape: f32[1,32], index: 2, kind: input, shape index: {}]   ;;  %s462_s3 = inlined_call_operand.hbm [shape: f32[32,128], index: 3, kind: input, shape index: {}]   ;;  %s463_s4 = inlined_call_operand.vmem [shape: f32[1,128], index: 4, kind: input, shape index: {}]   ;;  %s464_s5 = inlined_call_operand.hbm [shape: f32[2,128], index: 5, kind: output, shape index: {}]  }
   0x1   :  { %11 = vsyncpa [#allocation6], 0 }
   0x2   :  { %12 = vsyncpa [#allocation4], 0  ;;  %s399_s18 = smov [#allocation5]   ;;  %s400_s20 = smov [#allocation2]  }
   0x3   :  { %s30_s19 = sshll.u32 %s399_s18, 4  ;;  %s18_s21 = sshll.u32 %s400_s20, 4  ;;  %s31_s19 = int_to_ptr.vmem [resolvable:$true] %s30_s19  ;;  %s19_s21 = int_to_ptr.vmem [resolvable:$true] %s18_s21 }
   0x4   :  { %s321_s22 = scalar_lea.vmem %s31_s19, 512  ;;  %p326_p1 = scmp.lt.s32.totalorder %s31_s19, %s31_s19 }
   0x5   :  { %p322_p0 = scmp.ne.s32.totalorder %s31_s19, %s321_s22  ;;  %p327_p2 = scmp.lt.s32.totalorder %s321_s22, %s321_s22 }
   0x7   :  { %p328_p3 = por %p327_p2, %p326_p1 }
   0x9   :  { %p329_p4 = pnand %p328_p3, %p322_p0 }
   0xb   :  { %332 = shalt.err (!%p329_p4)
}
   0xc   :  { %s401_s23 = smov 128   ;;  %s402_s24 = smov 8  }
   0xd   :  { %36 = dma.hbm_to_vmem [thread:$0]  %s460_s1, 512, %s31_s19, [#allocation6], %s401_s23, %s401_s23, %s402_s24  }
   0xe   :  { %s341_s27 = scalar_lea.vmem %s19_s21, 256  ;;  %p346_p6 = scmp.lt.s32.totalorder %s19_s21, %s19_s21 }
   0xf   :  { %p342_p5 = scmp.ne.s32.totalorder %s19_s21, %s341_s27  ;;  %p347_p7 = scmp.lt.s32.totalorder %s341_s27, %s341_s27 }
  0x11   :  { %p348_p8 = por %p347_p7, %p346_p6 }
  0x13   :  { %p349_p9 = pnand %p348_p8, %p342_p5 }
  0x15   :  { %352 = shalt.err (!%p349_p9)
}
  0x16   :  { %24 = dma.hbm_to_vmem [thread:$0]  %s459_s0, 256, %s19_s21, [#allocation3], %s401_s23, %s401_s23, %s402_s24  }
  0x17   :  { %s403_s30 = smov [#allocation7]  }
  0x18   :  { %s44_s6 = sshll.u32 %s403_s30, 4  ;;  %s45_s6 = int_to_ptr.vmem [resolvable:$true] %s44_s6 }
  0x19   :  { %s361_s7 = scalar_lea.vmem %s45_s6, 512  ;;  %p366_p11 = scmp.lt.s32.totalorder %s45_s6, %s45_s6 }
  0x1a   :  { %p362_p10 = scmp.ne.s32.totalorder %s45_s6, %s361_s7  ;;  %p367_p12 = scmp.lt.s32.totalorder %s361_s7, %s361_s7 }
  0x1c   :  { %p368_p13 = por %p367_p12, %p366_p11 }
  0x1e   :  { %p369_p0 = pnand %p368_p13, %p362_p10 }
  0x20   :  { %372 = shalt.err (!%p369_p0)
}
  0x21   :  { %50 = dma.hbm_to_vmem [thread:$0]  %s462_s3, 512, %s45_s6, [#allocation6], %s401_s23, %s401_s23, %s402_s24  }
  0x22   :  { %393 = dma.done.wait [#allocation3], 256  }
  0x23   :  { %394 = vsyncadd [#allocation3], 4294967040 }
  0x24   :  { %395 = dma.done.wait [#allocation6], 1024  }
  0x25   :  { %396 = vsyncadd [#allocation6], 4294966272  ;;  %v404_v0 = vmov 0.0   ;;  %vm405_vm0 = vmmov 0   ;;  %vm64_vm1 = vcmask 261120   ;;  %v84_v1 = vld [vmem:[#allocation5 + $0x18] sm:$0xff] }
  0x26   :  { %283 = vmatprep.subr.mxu0 %v404_v0  ;;  %291 = vmatprep.mubr.msk.f32.mxu0 %vm405_vm0, %v404_v0  ;;  %v83_v2 = vld [vmem:[#allocation5 + $0x10] sm:$0xff]  ;;  %v63_v4 = vld [vmem:[#allocation2 + $0x8] sm:$0xff]  ;;  %v82_v5 = vld [vmem:[#allocation5 + $0x8] sm:$0xff]  ;;  %vm94_vm2 = vcmask 1041409   ;;  %s406_s11 = smov [#allocation8]  }
  0x27   :  { %294 = vmatprep.subr.mxu1 %v404_v0  ;;  %302 = vmatprep.mubr.msk.f32.mxu1 %vm405_vm0, %v404_v0  ;;  %v62_v3 = vld [vmem:[#allocation2] sm:$0xff]  ;;  %v72_v7 = vsel %vm64_vm1, %v63_v4, 0.0  ;;  %v171_v8 = vld [vmem:[#allocation7 + $0x18] sm:$0xff]  ;;  %v81_v12 = vld [vmem:[#allocation5] sm:$0xff]  ;;  %s259_s12 = sshll.u32 %s406_s11, 4  ;;  %s260_s12 = int_to_ptr.vmem [resolvable:$true] %s259_s12 }
  0x28   :  { %284 = vmatpush3.msra.mxu0 %v84_v1  ;;  %v65_v6 = vsel %vm64_vm1, %v62_v3, 0.0  ;;  %v170_v9 = vld [vmem:[#allocation7 + $0x10] sm:$0xff]  ;;  %v73_v11 = vrot.slane %v72_v7, 4  ;;  %295 = vmatpush3.msra.mxu1 %v171_v8  ;;  %v169_v26 = vld [vmem:[#allocation7 + $0x8] sm:$0xff]  ;;  %v168_v27 = vld [vmem:[#allocation7] sm:$0xff]  ;;  %s373_s13 = scalar_lea.vmem %s260_s12, 32  ;;  %p378_p2 = scmp.lt.s32.totalorder %s260_s12, %s260_s12 }
  0x29   :  { %285 = vmatprep.subr.mxu0 %v404_v0  ;;  %v66_v10 = vrot.slane %v65_v6, 4  ;;  %296 = vmatprep.subr.mxu1 %v404_v0  ;;  %v269_v28 = vld [vmem:[%s461_s2] ss:$0 sm:$0xff]  ;;  %p374_p1 = scmp.ne.s32.totalorder %s260_s12, %s373_s13  ;;  %p379_p3 = scmp.lt.s32.totalorder %s373_s13, %s373_s13 }
  0x2a   :  { %286 = vmatpush3.msra.mxu0 %v83_v2  ;;  %v74_v14 = vadd.f32 %v73_v11, %v72_v7  ;;  %297 = vmatpush3.msra.mxu1 %v170_v9  ;;  %v271_v32 = vld [vmem:[%s463_s4] ss:$0 sm:$0xff] }
  0x2b   :  { %287 = vmatprep.subr.mxu0 %v404_v0  ;;  %v67_v13 = vadd.f32 %v66_v10, %v65_v6  ;;  %298 = vmatprep.subr.mxu1 %v404_v0  ;;  %p380_p4 = por %p379_p3, %p378_p2 }
  0x2c   :  { %288 = vmatpush3.msra.mxu0 %v82_v5  ;;  %v75_v16 = vrot.slane %v74_v14, 2  ;;  %299 = vmatpush3.msra.mxu1 %v169_v26 }
  0x2d   :  { %289 = vmatprep.subr.mxu0 %v404_v0  ;;  %v68_v15 = vrot.slane %v67_v13, 2  ;;  %300 = vmatprep.subr.mxu1 %v404_v0  ;;  %p381_p5 = pnand %p380_p4, %p374_p1 }
  0x2e   :  { %290 = vmatpush3.msra.mxu0 %v81_v12  ;;  %v76_v18 = vadd.f32 %v75_v16, %v74_v14  ;;  %301 = vmatpush3.msra.mxu1 %v168_v27 }
  0x2f   :  { %v69_v17 = vadd.f32 %v68_v15, %v67_v13 }
  0x30   :  { %v77_v20 = vrot.slane %v76_v18, 1 }
  0x31   :  { %v70_v19 = vrot.slane %v69_v17, 1 }
  0x32   :  { %v78_v22 = vadd.f32 %v77_v20, %v76_v18 }
  0x33   :  { %v71_v21 = vadd.f32 %v70_v19, %v69_v17 }
  0x34   :  { %v80_v24 = vmul.f32 0.125, %v78_v22 }
  0x35   :  { %v79_v23 = vmul.f32 0.125, %v71_v21 }
  0x37   :  { %v95_v25 = vsel %vm94_vm2, %v80_v24, %v79_v23 }
  0x38   :  { %292 = vmatmul.mubr.msk.f32.vlgmr.msra.gmra.mxu0 %vm64_vm1, %v95_v25 }
  0xf8   :  { %v164_v29 = vpop.f32.mrf.mxu0 }
  0xf9   :  { %v165_v30 = vadd.f32 %v269_v28, %v164_v29 }
  0xfa   :  { %v293_v31 = vpop.f32.mrf.mxu0 }
  0xfb   :  { %303 = vmatmul.mubr.msk.f32.vlgmr.msra.gmra.mxu1 %vm64_vm1, %v165_v30 }
 0x1bb   :  { %v248_v33 = vpop.f32.mrf.mxu1 }
 0x1bc   :  { %v249_v34 = vadd.f32 %v271_v32, %v248_v33 }
 0x1bd   :  { %v304_v35 = vpop.f32.mrf.mxu1 }
 0x1be   :  { %252 = vst [vmem:[#allocation8] sm:$0x3] %v249_v34 }
 0x1bf   :  { %384 = shalt.err (!%p381_p5)
}
 0x1c0   :  { %262 = dma.vmem_to_hbm [thread:$0]  %s260_s12, 32, %s464_s5, [#allocation4]  }
 0x1c1   :  { %397 = dma.done.wait [#allocation4], 32  }
 0x1c2   :  { %398 = vsyncadd [#allocation4], 4294967264 }
 0x1c3   :  { %266 = vsyncpa [#allocation3], 1 }
 0x1c4   :  { %267 = vsyncpa [#allocation6], 1 }
 0x1c5   :  { %268 = vsyncpa [#allocation4], 1 }

</bundles_post_ra>
